<compile_context>
chip_gen: v6e
topology: v6e:2x2x1
jax: 0.10.0
libtpu: 0.0.40
codegen_flags: <defaults>
</compile_context>

<pallas_src>
import functools

import jax
import jax.numpy as jnp
import numpy as np
from jax.experimental import pallas as pl
from jax.experimental.pallas import tpu as pltpu

BN_EPS = 1e-5


def _round_up(x, m):
    return ((x + m - 1) // m) * m


def _gelu(x):
    # tanh-approximation GELU: one EUP tanh (otherwise-idle VLIW slot) instead of a
    # ~12-op VALU erf polynomial.  |diff| vs exact erf-GELU < ~4e-4.
    c = 0.7978845608028654  # sqrt(2/pi)
    return 0.5 * x * (1.0 + jnp.tanh(c * (x + 0.044715 * x * x * x)))


# --------------------------- fused forward kernel ----------------------------
def _fused_forward_kernel(xp_ref, w0_ref, v0_ref, wdw_ref, vblk_ref, wpw_ref,
                          wfc_ref, bfc_ref, o_ref, xpad_sc, *rest_sc,
                          pad_l, halo_off, lp, ch, n_chunks):
    prev_sc = rest_sc[0] if rest_sc else None   # chunk ping buffer (only if n_chunks > 1)
    d = pl.program_id(1)                        # ConvMixer block index (inner grid axis)
    n_blocks = pl.num_programs(1)
    bt, halo_rows, dp = xpad_sc.shape
    k = wdw_ref.shape[0]
    off0 = halo_off - pad_l                     # scratch row where tap j=0 starts
    mm_dtype = w0_ref.dtype                     # bf16 (default) or f32

    # ---- first depth step for this batch tile: zero halo rows + patchify --------
    @pl.when(d == 0)
    def _patchify():
        # Zero ONLY the halo rows; the interior is fully overwritten just below.
        if halo_off > 0:
            xpad_sc[:, 0:halo_off, :] = jnp.zeros((bt, halo_off, dp), jnp.float32)
        tail = halo_rows - halo_off - lp
        if tail > 0:
            xpad_sc[:, halo_off + lp:, :] = jnp.zeros((bt, tail, dp), jnp.float32)
        xp = xp_ref[...].reshape(bt * lp, xp_ref.shape[-1])
        y0 = jnp.dot(xp.astype(mm_dtype), w0_ref[...],
                     preferred_element_type=jnp.float32)       # Conv1d(stride=patch)
        y0 = _gelu(y0 + v0_ref[0:1, :])                        # bias + GELU
        y0 = y0 * v0_ref[1:2, :] + v0_ref[2:3, :]              # BatchNorm (eval affine)
        xpad_sc[:, halo_off:halo_off + lp, :] = y0.reshape(bt, lp, dp)

    # ---- ConvMixer block d (in place in xpad_sc's interior) ---------------------
    wdw = wdw_ref[...]                                         # (k, dp), loaded once
    bdw = vblk_ref[0:1, :].reshape(1, 1, dp)
    s1 = vblk_ref[1:2, :].reshape(1, 1, dp)
    h1 = vblk_ref[2:3, :].reshape(1, 1, dp)
    bpw = vblk_ref[3:4, :]
    s2 = vblk_ref[4:5, :]
    h2 = vblk_ref[5:6, :]
    wpw = wpw_ref[...]

    def _interior_row(start):
        row = halo_off + start
        if ch % 8 == 0 and not isinstance(start, int):
            row = pl.multiple_of(row, 8)                       # sublane-aligned hint
        return row

    def _compute_chunk(start):
        # depthwise Conv1d(groups=dim, padding='same') as shifted multiply-adds (VPU)
        base = off0 + start
        acc = xpad_sc[:, pl.ds(base, ch), :] * wdw[0]
        for j in range(1, k):                                  # static unroll over taps
            acc = acc + xpad_sc[:, pl.ds(base + j, ch), :] * wdw[j]
        y_res = xpad_sc[:, pl.ds(_interior_row(start), ch), :]
        h = _gelu(acc + bdw) * s1 + h1 + y_res                 # GELU + BN1 + residual
        # pointwise 1x1 conv == channel matmul on the MXU (bf16 in / f32 accumulate)
        z = jnp.dot(h.reshape(bt * ch, dp).astype(mm_dtype), wpw,
                    preferred_element_type=jnp.float32)
        z = _gelu(z + bpw) * s2 + h2                           # bias + GELU + BN2
        return z.reshape(bt, ch, dp)

    if n_chunks == 1:
        # Whole interior at once; all reads precede the single in-place write.
        z = _compute_chunk(0)
        xpad_sc[:, halo_off:halo_off + lp, :] = z
    else:
        # Delayed-write chunking: chunk c's output is flushed only while processing
        # chunk c+1 (after its left-halo reads), so the in-place update is safe.
        @pl.loop(0, n_chunks)
        def _(c):
            start = c * ch
            z = _compute_chunk(start)

            @pl.when(c > 0)
            def _flush_prev():
                xpad_sc[:, pl.ds(_interior_row((c - 1) * ch), ch), :] = prev_sc[...]

            @pl.when(c == n_chunks - 1)
            def _write_last():
                xpad_sc[:, pl.ds(_interior_row(start), ch), :] = z

            @pl.when(c < n_chunks - 1)
            def _stash():
                prev_sc[...] = z

    # ---- last depth step: AdaptiveAvgPool1d(1) + Flatten + Linear + LeakyReLU ----
    @pl.when(d == n_blocks - 1)
    def _head():
        pooled = jnp.mean(xpad_sc[:, halo_off:halo_off + lp, :], axis=1)   # (bt, dp)
        logits = jnp.dot(pooled.astype(mm_dtype), wfc_ref[...],
                         preferred_element_type=jnp.float32) + bfc_ref[...]
        o_ref[...] = jnp.where(logits >= 0.0, logits, 0.01 * logits)


# ------------------------------- glue / wrapper -------------------------------
def _bn_affine(bn):
    gamma, beta, mean, var = bn
    scale = gamma / jnp.sqrt(var + BN_EPS)
    shift = beta - mean * scale
    return scale, shift


def _pad_last(a, target):
    pad = target - a.shape[-1]
    if pad == 0:
        return a
    widths = [(0, 0)] * (a.ndim - 1) + [(0, pad)]
    return jnp.pad(a, widths)


def _vmem_capacity_bytes():
    try:
        info = pltpu.get_tpu_info()
        cap = getattr(info, "vmem_capacity_bytes", None)
        if cap:
            return int(cap)
    except Exception:
        pass
    return 64 * 1024 * 1024   # conservative default (v7x per-TensorCore VMEM)


def _pick_chunk(Lp, l_chunk, pad_l):
    if Lp <= l_chunk:
        return Lp, 1
    cand = (min(l_chunk, Lp) // 8) * 8
    while cand >= max(8, pad_l):
        if Lp % cand == 0:
            return cand, Lp // cand
        cand -= 8
    return Lp, 1                      # no clean divisor: fall back to one chunk


def _vmem_estimate(bt, Lp, CP, Dp, Ncp, k, halo_rows, ch, n_chunks, mm_bytes):
    scratch = bt * halo_rows * Dp * 4
    if n_chunks > 1:
        scratch += bt * ch * Dp * 4
    dbuf = 2 * (bt * Lp * CP * 4        # xp
                + CP * Dp * mm_bytes    # w0
                + 3 * Dp * 4            # v0
                + k * Dp * 4            # wdw block
                + 6 * Dp * 4            # vblk block
                + Dp * Dp * mm_bytes    # wpw block
                + Dp * Ncp * mm_bytes   # wfc
                + Ncp * 4               # bfc
                + bt * Ncp * 4)         # out
    return scratch + dbuf


def subject_classifier_forward(x_ncl, params, *, patch_size, kernel_size,
                               b_tile=None, l_chunk=256,
                               matmul_dtype=jnp.bfloat16):
    B, C, L = x_ncl.shape
    dim = params["w0"].shape[0]
    n_classes = params["wfc"].shape[0]
    depth = len(params["blocks"])
    k = kernel_size
    assert L % patch_size == 0
    Lp = L // patch_size
    CP = C * patch_size
    lane = 256 if dim >= 256 else 128      # fill the 256-wide v6e/v7x MXU when possible
    Dp = _round_up(dim, lane)              # lane-dense channel axis
    Ncp = _round_up(n_classes, 128)        # lane-dense head output

    pad_l = (k - 1) // 2
    pad_r = k - 1 - pad_l
    halo_off = _round_up(pad_l, 8)         # sublane-aligned interior offset
    halo_rows = _round_up(halo_off + Lp + pad_r, 8)

    mm_bytes = np.dtype(matmul_dtype).itemsize
    cap = _vmem_capacity_bytes()
    ch, n_chunks = _pick_chunk(Lp, l_chunk, pad_l)
    if n_chunks > 1:
        assert ch >= pad_l, "chunk must cover the depthwise left halo"

    # ---- batch-tile selection: fill the MXU M dim, keep nb>=2, fit VMEM budget ----
    if b_tile is None:
        budget = int(0.6 * cap)
        b_tile = 1
        for bt in range(1, B + 1):
            if B % bt:
                continue
            if B >= 2 and B // bt < 2:
                break   # keep >=2 batch tiles so "parallel" axis shards across v7x's 2 TCs
            if _vmem_estimate(bt, Lp, CP, Dp, Ncp, k, halo_rows, ch,
                              n_chunks, mm_bytes) > budget:
                break
            b_tile = bt
            if bt * Lp >= 512:
                break   # MXU M dimension already well filled
    assert B % b_tile == 0
    nb = B // b_tile

    need = _vmem_estimate(b_tile, Lp, CP, Dp, Ncp, k, halo_rows, ch, n_chunks, mm_bytes)
    vmem_limit = int(min(0.9 * cap, max(32 * 1024 * 1024, 1.5 * need)))

    # NCL input -> one row per patch: (B, Lp, C*patch)
    xp = (x_ncl.reshape(B, C, Lp, patch_size)
          .transpose(0, 2, 1, 3)
          .reshape(B, Lp, CP))

    # Patchifier weights (channels zero-padded to Dp; padded channels stay zero).
    w0 = _pad_last(params["w0"].reshape(dim, CP).T, Dp).astype(matmul_dtype)
    s0, h0 = _bn_affine(params["bn0"])
    v0 = _pad_last(jnp.stack([params["b0"], s0, h0], axis=0), Dp)       # (3, Dp)

    # Stacked per-block weights indexed by the depth grid axis.
    wdw_all, vblk_all, wpw_all = [], [], []
    for blk in params["blocks"]:
        wdw_all.append(_pad_last(blk["wdw"].reshape(dim, k).T, Dp))     # (k, Dp)
        s1, h1 = _bn_affine(blk["bn1"])
        s2, h2 = _bn_affine(blk["bn2"])
        vblk_all.append(_pad_last(
            jnp.stack([blk["bdw"], s1, h1, blk["bpw"], s2, h2], axis=0), Dp))
        wpw = blk["wpw"].reshape(dim, dim).T
        wpw = jnp.pad(wpw, ((0, Dp - dim), (0, Dp - dim)))
        wpw_all.append(wpw.astype(matmul_dtype))                        # (Dp, Dp)
    wdw_all = jnp.stack(wdw_all)       # (depth, k,  Dp)  f32
    vblk_all = jnp.stack(vblk_all)     # (depth, 6,  Dp)  f32
    wpw_all = jnp.stack(wpw_all)       # (depth, Dp, Dp)  matmul_dtype

    # Head weights (lane-padded output width, matmul dtype for MXU + VMEM footprint).
    wfc = jnp.pad(params["wfc"].T,
                  ((0, Dp - dim), (0, Ncp - n_classes))).astype(matmul_dtype)
    bfc = _pad_last(params["bfc"].reshape(1, -1), Ncp)

    kernel = functools.partial(_fused_forward_kernel, pad_l=pad_l,
                               halo_off=halo_off, lp=Lp, ch=ch,
                               n_chunks=n_chunks)

    scratch_shapes = [pltpu.VMEM((b_tile, halo_rows, Dp), jnp.float32)]  # resident act.
    if n_chunks > 1:
        scratch_shapes.append(pltpu.VMEM((b_tile, ch, Dp), jnp.float32))  # delayed-write buf

    out = pl.pallas_call(
        kernel,
        out_shape=jax.ShapeDtypeStruct((nb, b_tile, Ncp), jnp.float32),
        grid_spec=pltpu.PrefetchScalarGridSpec(
            num_scalar_prefetch=0,
            grid=(nb, depth),
            in_specs=[
                pl.BlockSpec((b_tile, Lp, CP), lambda b, d: (b, 0, 0)),   # xp
                pl.BlockSpec((CP, Dp), lambda b, d: (0, 0)),              # w0
                pl.BlockSpec((3, Dp), lambda b, d: (0, 0)),               # b0/s0/h0
                pl.BlockSpec((None, k, Dp), lambda b, d: (d, 0, 0)),      # wdw (per block)
                pl.BlockSpec((None, 6, Dp), lambda b, d: (d, 0, 0)),      # block vectors
                pl.BlockSpec((None, Dp, Dp), lambda b, d: (d, 0, 0)),     # wpw (per block)
                pl.BlockSpec((Dp, Ncp), lambda b, d: (0, 0)),             # wfc
                pl.BlockSpec((1, Ncp), lambda b, d: (0, 0)),              # bfc
            ],
            out_specs=pl.BlockSpec((None, b_tile, Ncp), lambda b, d: (b, 0, 0)),
            scratch_shapes=scratch_shapes,
        ),
        compiler_params=pltpu.CompilerParams(
            dimension_semantics=("parallel", "arbitrary"),
            vmem_limit_bytes=vmem_limit,
        ),
    )(xp, w0, v0, wdw_all, vblk_all, wpw_all, wfc, bfc)

    return out.reshape(B, Ncp)[:, :n_classes]


# ----------------------------- parameters -------------------------------------
def init_params(key, in_chans, dim, depth, kernel_size, patch_size, n_classes):
    ks = jax.random.split(key, 5 + depth)

    def bn_params(kk):
        k1, k2, k3, k4 = jax.random.split(kk, 4)
        gamma = 1.0 + 0.1 * jax.random.normal(k1, (dim,), jnp.float32)
        beta = 0.1 * jax.random.normal(k2, (dim,), jnp.float32)
        mean = 0.1 * jax.random.normal(k3, (dim,), jnp.float32)
        var = jax.random.uniform(k4, (dim,), jnp.float32, 0.5, 1.5)
        return gamma, beta, mean, var

    params = {
        "w0": jax.random.normal(ks[0], (dim, in_chans, patch_size), jnp.float32)
              / np.sqrt(in_chans * patch_size),
        "b0": 0.1 * jax.random.normal(ks[1], (dim,), jnp.float32),
        "bn0": bn_params(ks[2]),
        "blocks": [],
        "wfc": jax.random.normal(ks[3 + depth], (n_classes, dim), jnp.float32)
               / np.sqrt(dim),
        "bfc": 0.1 * jax.random.normal(ks[4 + depth], (n_classes,), jnp.float32),
    }
    for i in range(depth):
        kb = jax.random.split(ks[3 + i], 6)
        params["blocks"].append(dict(
            wdw=jax.random.normal(kb[0], (dim, 1, kernel_size), jnp.float32)
                / np.sqrt(kernel_size),
            bdw=0.1 * jax.random.normal(kb[1], (dim,), jnp.float32),
            bn1=bn_params(kb[2]),
            wpw=jax.random.normal(kb[3], (dim, dim, 1), jnp.float32) / np.sqrt(dim),
            bpw=0.1 * jax.random.normal(kb[4], (dim,), jnp.float32),
            bn2=bn_params(kb[5]),
        ))
    return params


# --------------------- pure-JAX reference (NCL, PyTorch-like) ------------------
def reference_forward(x_ncl, params, *, patch_size, kernel_size):
    B, C, L = x_ncl.shape
    Lp = L // patch_size
    HI = jax.lax.Precision.HIGHEST
    gelu = lambda v: 0.5 * v * (1.0 + jax.scipy.special.erf(v / np.sqrt(2.0)))

    def bn(v, p):  # v: (B, dim, T), eval-mode BatchNorm1d
        gamma, beta, mean, var = p
        return ((v - mean[None, :, None]) / jnp.sqrt(var + BN_EPS)[None, :, None]
                * gamma[None, :, None] + beta[None, :, None])

    xr = x_ncl.reshape(B, C, Lp, patch_size)
    y = jnp.einsum("bctp,dcp->bdt", xr, params["w0"],
                   precision=HI) + params["b0"][None, :, None]
    y = bn(gelu(y), params["bn0"])

    pad_l = (kernel_size - 1) // 2
    pad_r = kernel_size - 1 - pad_l
    for blk in params["blocks"]:
        xpad = jnp.pad(y, ((0, 0), (0, 0), (pad_l, pad_r)))
        dw = sum(blk["wdw"][:, 0, j][None, :, None] * xpad[:, :, j:j + Lp]
                 for j in range(kernel_size)) + blk["bdw"][None, :, None]
        h = bn(gelu(dw), blk["bn1"]) + y
        pw = jnp.einsum("bdt,ed->bet", h, blk["wpw"][:, :, 0],
                        precision=HI) + blk["bpw"][None, :, None]
        y = bn(gelu(pw), blk["bn2"])

    pooled = jnp.mean(y, axis=2)
    logits = jnp.dot(pooled, params["wfc"].T, precision=HI) + params["bfc"]
    return jnp.where(logits >= 0, logits, 0.01 * logits)


# ------------------------------------ main -------------------------------------
if __name__ == "__main__":
    B, in_chans, L = 2, 4, 64
    dim, depth, kernel_size, patch_size, n_classes = 32, 2, 9, 4, 5

    key = jax.random.PRNGKey(0)
    kx, kp = jax.random.split(key)
    x = jax.random.normal(kx, (B, in_chans, L), jnp.float32)
    params = init_params(kp, in_chans, dim, depth, kernel_size, patch_size,
                         n_classes)

    ref = jax.block_until_ready(
        reference_forward(x, params, patch_size=patch_size,
                          kernel_size=kernel_size))

    # Run both the single-chunk path (default l_chunk) and the delayed-write chunked
    # path (l_chunk=8 -> 2 chunks of 8 rows) so both code paths are validated.
    for lc in (256, 8):
        fwd = jax.jit(functools.partial(subject_classifier_forward,
                                        patch_size=patch_size,
                                        kernel_size=kernel_size,
                                        l_chunk=lc))
        out = jax.block_until_ready(fwd(x, params))
        assert out.shape == (B, n_classes), out.shape
        # Tolerance covers bf16 MXU inputs (f32 accumulation) + tanh-GELU vs the
        # f32 / exact-erf reference; observed deviations are well below this.
        np.testing.assert_allclose(np.asarray(out), np.asarray(ref),
                                   atol=5e-2, rtol=5e-2)
    print("KERNEL_OK")
</pallas_src>

<mosaic_0001>
module attributes {stable_mosaic.version = 11 : i64} {
  func.func @_fused_forward_kernel(%arg0: i32, %arg1: i32, %arg2: memref<1x16x16xf32, #tpu.memory_space<vmem>>, %arg3: memref<16x128xbf16, #tpu.memory_space<vmem>>, %arg4: memref<3x128xf32, #tpu.memory_space<vmem>>, %arg5: memref<1x9x128xf32, #tpu.memory_space<vmem>>, %arg6: memref<1x6x128xf32, #tpu.memory_space<vmem>>, %arg7: memref<1x128x128xbf16, #tpu.memory_space<vmem>>, %arg8: memref<128x128xbf16, #tpu.memory_space<vmem>>, %arg9: memref<1x128xf32, #tpu.memory_space<vmem>>, %arg10: memref<1x1x128xf32, #tpu.memory_space<vmem>>, %arg11: memref<1x32x128xf32, #tpu.memory_space<vmem>>) attributes {dimension_semantics = [#tpu.dimension_semantics<parallel>, #tpu.dimension_semantics<arbitrary>], iteration_bounds = array<i64: 2, 2>, scalar_prefetch = 0 : i64, scratch_operands = 1 : i64, tpu.core_type = #tpu.core_type<tc>, window_params = [{transform_indices = @transform_0, window_bounds = array<i64: 1, 16, 16>}, {pipeline_mode = #tpu.pipeline_mode<synchronous>, transform_indices = @transform_1, window_bounds = array<i64: 16, 128>}, {pipeline_mode = #tpu.pipeline_mode<synchronous>, transform_indices = @transform_2, window_bounds = array<i64: 3, 128>}, {transform_indices = @transform_3, window_bounds = array<i64: 1, 9, 128>}, {transform_indices = @transform_4, window_bounds = array<i64: 1, 6, 128>}, {transform_indices = @transform_5, window_bounds = array<i64: 1, 128, 128>}, {pipeline_mode = #tpu.pipeline_mode<synchronous>, transform_indices = @transform_6, window_bounds = array<i64: 128, 128>}, {pipeline_mode = #tpu.pipeline_mode<synchronous>, transform_indices = @transform_7, window_bounds = array<i64: 1, 128>}, {transform_indices = @transform_8, window_bounds = array<i64: 1, 1, 128>}]} {
    %c0_i32 = arith.constant 0 : i32
    %0 = arith.cmpi eq, %arg1, %c0_i32 : i32
    %1 = arith.extui %0 : i1 to i32
    %c0_i32_0 = arith.constant 0 : i32
    %2 = arith.cmpi ne, %1, %c0_i32_0 : i32
    scf.if %2 {
      %cst_54 = arith.constant 0.000000e+00 : f32
      %132 = vector.broadcast %cst_54 : f32 to vector<1x8x128xf32>
      %c0_55 = arith.constant 0 : index
      %c0_56 = arith.constant 0 : index
      %c0_57 = arith.constant 0 : index
      %133 = vector.load %arg11[%c0_55, %c0_56, %c0_57] : memref<1x32x128xf32, #tpu.memory_space<vmem>>, vector<1x8x128xf32>
      tpu.vector_store %arg11[%c0_55, %c0_56, %c0_57], %132 {strides = array<i32>} : memref<1x32x128xf32, #tpu.memory_space<vmem>>, vector<1x8x128xf32>,
      %cst_58 = arith.constant 0.000000e+00 : f32
      %134 = vector.broadcast %cst_58 : f32 to vector<1x8x128xf32>
      %c0_59 = arith.constant 0 : index
      %c24 = arith.constant 24 : index
      %c0_60 = arith.constant 0 : index
      %135 = vector.load %arg11[%c0_59, %c24, %c0_60] : memref<1x32x128xf32, #tpu.memory_space<vmem>>, vector<1x8x128xf32>
      tpu.vector_store %arg11[%c0_59, %c24, %c0_60], %134 {strides = array<i32>} : memref<1x32x128xf32, #tpu.memory_space<vmem>>, vector<1x8x128xf32>,
      %c0_61 = arith.constant 0 : index
      %c0_62 = arith.constant 0 : index
      %c0_63 = arith.constant 0 : index
      %136 = vector.load %arg2[%c0_61, %c0_62, %c0_63] : memref<1x16x16xf32, #tpu.memory_space<vmem>>, vector<1x16x16xf32>
      %137 = vector.shape_cast %136 : vector<1x16x16xf32> to vector<16x16xf32>
      %138 = arith.truncf %137 : vector<16x16xf32> to vector<16x16xbf16>
      %c0_64 = arith.constant 0 : index
      %c0_65 = arith.constant 0 : index
      %139 = vector.load %arg3[%c0_64, %c0_65] : memref<16x128xbf16, #tpu.memory_space<vmem>>, vector<16x128xbf16>
      %cst_66 = arith.constant dense<0.000000e+00> : vector<16x128xf32>
      %140 = tpu.matmul %138, %139, %cst_66 {dimension_numbers = #tpu.dot_dimension_numbers<[1], [0], [0], [1], [0, 0, 1, 1], [], []>} : vector<16x16xbf16>, vector<16x128xbf16>, vector<16x128xf32> -> vector<16x128xf32>
      %c0_67 = arith.constant 0 : index
      %c0_68 = arith.constant 0 : index
      %141 = vector.load %arg4[%c0_67, %c0_68] : memref<3x128xf32, #tpu.memory_space<vmem>>, vector<1x128xf32>
      %142 = vector.broadcast %141 : vector<1x128xf32> to vector<16x128xf32>
      %143 = arith.addf %140, %142 : vector<16x128xf32>
      %cst_69 = arith.constant 5.000000e-01 : f32
      %144 = vector.broadcast %cst_69 : f32 to vector<16x128xf32>
      %145 = arith.mulf %144, %143 : vector<16x128xf32>
      %cst_70 = arith.constant 4.471500e-02 : f32
      %146 = vector.broadcast %cst_70 : f32 to vector<16x128xf32>
      %147 = arith.mulf %146, %143 : vector<16x128xf32>
      %148 = arith.mulf %147, %143 : vector<16x128xf32>
      %149 = arith.mulf %148, %143 : vector<16x128xf32>
      %150 = arith.addf %143, %149 : vector<16x128xf32>
      %cst_71 = arith.constant 0.797884583 : f32
      %151 = vector.broadcast %cst_71 : f32 to vector<16x128xf32>
      %152 = arith.mulf %151, %150 : vector<16x128xf32>
      %153 = math.tanh %152 : vector<16x128xf32>
      %cst_72 = arith.constant 1.000000e+00 : f32
      %154 = vector.broadcast %cst_72 : f32 to vector<16x128xf32>
      %155 = arith.addf %154, %153 : vector<16x128xf32>
      %156 = arith.mulf %145, %155 : vector<16x128xf32>
      %c1_73 = arith.constant 1 : index
      %c0_74 = arith.constant 0 : index
      %157 = vector.load %arg4[%c1_73, %c0_74] : memref<3x128xf32, #tpu.memory_space<vmem>>, vector<1x128xf32>
      %158 = vector.broadcast %157 : vector<1x128xf32> to vector<16x128xf32>
      %159 = arith.mulf %156, %158 : vector<16x128xf32>
      %c2_75 = arith.constant 2 : index
      %c0_76 = arith.constant 0 : index
      %160 = vector.load %arg4[%c2_75, %c0_76] : memref<3x128xf32, #tpu.memory_space<vmem>>, vector<1x128xf32>
      %161 = vector.broadcast %160 : vector<1x128xf32> to vector<16x128xf32>
      %162 = arith.addf %159, %161 : vector<16x128xf32>
      %163 = vector.shape_cast %162 : vector<16x128xf32> to vector<1x16x128xf32>
      %c0_77 = arith.constant 0 : index
      %c8_78 = arith.constant 8 : index
      %c0_79 = arith.constant 0 : index
      %164 = vector.load %arg11[%c0_77, %c8_78, %c0_79] : memref<1x32x128xf32, #tpu.memory_space<vmem>>, vector<1x16x128xf32>
      tpu.vector_store %arg11[%c0_77, %c8_78, %c0_79], %163 {strides = array<i32>} : memref<1x32x128xf32, #tpu.memory_space<vmem>>, vector<1x16x128xf32>,
    } else {
    }
    %c0 = arith.constant 0 : index
    %c0_1 = arith.constant 0 : index
    %c0_2 = arith.constant 0 : index
    %3 = vector.load %arg5[%c0, %c0_1, %c0_2] : memref<1x9x128xf32, #tpu.memory_space<vmem>>, vector<1x9x128xf32>
    %4 = vector.shape_cast %3 : vector<1x9x128xf32> to vector<9x128xf32>
    %c0_3 = arith.constant 0 : index
    %c0_4 = arith.constant 0 : index
    %c0_5 = arith.constant 0 : index
    %5 = vector.load %arg6[%c0_3, %c0_4, %c0_5] : memref<1x6x128xf32, #tpu.memory_space<vmem>>, vector<1x1x128xf32>
    %6 = vector.shape_cast %5 : vector<1x1x128xf32> to vector<1x128xf32>
    %7 = vector.shape_cast %6 : vector<1x128xf32> to vector<1x1x128xf32>
    %c0_6 = arith.constant 0 : index
    %c1 = arith.constant 1 : index
    %c0_7 = arith.constant 0 : index
    %8 = vector.load %arg6[%c0_6, %c1, %c0_7] : memref<1x6x128xf32, #tpu.memory_space<vmem>>, vector<1x1x128xf32>
    %9 = vector.shape_cast %8 : vector<1x1x128xf32> to vector<1x128xf32>
    %10 = vector.shape_cast %9 : vector<1x128xf32> to vector<1x1x128xf32>
    %c0_8 = arith.constant 0 : index
    %c2 = arith.constant 2 : index
    %c0_9 = arith.constant 0 : index
    %11 = vector.load %arg6[%c0_8, %c2, %c0_9] : memref<1x6x128xf32, #tpu.memory_space<vmem>>, vector<1x1x128xf32>
    %12 = vector.shape_cast %11 : vector<1x1x128xf32> to vector<1x128xf32>
    %13 = vector.shape_cast %12 : vector<1x128xf32> to vector<1x1x128xf32>
    %c0_10 = arith.constant 0 : index
    %c3 = arith.constant 3 : index
    %c0_11 = arith.constant 0 : index
    %14 = vector.load %arg6[%c0_10, %c3, %c0_11] : memref<1x6x128xf32, #tpu.memory_space<vmem>>, vector<1x1x128xf32>
    %15 = vector.shape_cast %14 : vector<1x1x128xf32> to vector<1x128xf32>
    %c0_12 = arith.constant 0 : index
    %c4 = arith.constant 4 : index
    %c0_13 = arith.constant 0 : index
    %16 = vector.load %arg6[%c0_12, %c4, %c0_13] : memref<1x6x128xf32, #tpu.memory_space<vmem>>, vector<1x1x128xf32>
    %17 = vector.shape_cast %16 : vector<1x1x128xf32> to vector<1x128xf32>
    %c0_14 = arith.constant 0 : index
    %c5 = arith.constant 5 : index
    %c0_15 = arith.constant 0 : index
    %18 = vector.load %arg6[%c0_14, %c5, %c0_15] : memref<1x6x128xf32, #tpu.memory_space<vmem>>, vector<1x1x128xf32>
    %19 = vector.shape_cast %18 : vector<1x1x128xf32> to vector<1x128xf32>
    %c0_16 = arith.constant 0 : index
    %c0_17 = arith.constant 0 : index
    %c0_18 = arith.constant 0 : index
    %20 = vector.load %arg7[%c0_16, %c0_17, %c0_18] : memref<1x128x128xbf16, #tpu.memory_space<vmem>>, vector<1x128x128xbf16>
    %21 = vector.shape_cast %20 : vector<1x128x128xbf16> to vector<128x128xbf16>
    %c0_19 = arith.constant 0 : index
    %c4_20 = arith.constant 4 : index
    %c0_21 = arith.constant 0 : index
    %22 = vector.load %arg11[%c0_19, %c4_20, %c0_21] : memref<1x32x128xf32, #tpu.memory_space<vmem>>, vector<1x16x128xf32>
    %23 = vector.extract_strided_slice %4 {offsets = [0, 0], sizes = [1, 128], strides = [1, 1]} : vector<9x128xf32> to vector<1x128xf32>
    %24 = vector.shape_cast %23 : vector<1x128xf32> to vector<128xf32>
    %25 = vector.shape_cast %24 : vector<128xf32> to vector<1x1x128xf32>
    %26 = vector.broadcast %25 : vector<1x1x128xf32> to vector<1x16x128xf32>
    %27 = arith.mulf %22, %26 : vector<1x16x128xf32>
    %c0_22 = arith.constant 0 : index
    %c5_23 = arith.constant 5 : index
    %c0_24 = arith.constant 0 : index
    %28 = vector.load %arg11[%c0_22, %c5_23, %c0_24] : memref<1x32x128xf32, #tpu.memory_space<vmem>>, vector<1x16x128xf32>
    %29 = vector.extract_strided_slice %4 {offsets = [1, 0], sizes = [1, 128], strides = [1, 1]} : vector<9x128xf32> to vector<1x128xf32>
    %30 = vector.shape_cast %29 : vector<1x128xf32> to vector<128xf32>
    %31 = vector.shape_cast %30 : vector<128xf32> to vector<1x1x128xf32>
    %32 = vector.broadcast %31 : vector<1x1x128xf32> to vector<1x16x128xf32>
    %33 = arith.mulf %28, %32 : vector<1x16x128xf32>
    %34 = arith.addf %27, %33 : vector<1x16x128xf32>
    %c0_25 = arith.constant 0 : index
    %c6 = arith.constant 6 : index
    %c0_26 = arith.constant 0 : index
    %35 = vector.load %arg11[%c0_25, %c6, %c0_26] : memref<1x32x128xf32, #tpu.memory_space<vmem>>, vector<1x16x128xf32>
    %36 = vector.extract_strided_slice %4 {offsets = [2, 0], sizes = [1, 128], strides = [1, 1]} : vector<9x128xf32> to vector<1x128xf32>
    %37 = vector.shape_cast %36 : vector<1x128xf32> to vector<128xf32>
    %38 = vector.shape_cast %37 : vector<128xf32> to vector<1x1x128xf32>
    %39 = vector.broadcast %38 : vector<1x1x128xf32> to vector<1x16x128xf32>
    %40 = arith.mulf %35, %39 : vector<1x16x128xf32>
    %41 = arith.addf %34, %40 : vector<1x16x128xf32>
    %c0_27 = arith.constant 0 : index
    %c7 = arith.constant 7 : index
    %c0_28 = arith.constant 0 : index
    %42 = vector.load %arg11[%c0_27, %c7, %c0_28] : memref<1x32x128xf32, #tpu.memory_space<vmem>>, vector<1x16x128xf32>
    %43 = vector.extract_strided_slice %4 {offsets = [3, 0], sizes = [1, 128], strides = [1, 1]} : vector<9x128xf32> to vector<1x128xf32>
    %44 = vector.shape_cast %43 : vector<1x128xf32> to vector<128xf32>
    %45 = vector.shape_cast %44 : vector<128xf32> to vector<1x1x128xf32>
    %46 = vector.broadcast %45 : vector<1x1x128xf32> to vector<1x16x128xf32>
    %47 = arith.mulf %42, %46 : vector<1x16x128xf32>
    %48 = arith.addf %41, %47 : vector<1x16x128xf32>
    %c0_29 = arith.constant 0 : index
    %c8 = arith.constant 8 : index
    %c0_30 = arith.constant 0 : index
    %49 = vector.load %arg11[%c0_29, %c8, %c0_30] : memref<1x32x128xf32, #tpu.memory_space<vmem>>, vector<1x16x128xf32>
    %50 = vector.extract_strided_slice %4 {offsets = [4, 0], sizes = [1, 128], strides = [1, 1]} : vector<9x128xf32> to vector<1x128xf32>
    %51 = vector.shape_cast %50 : vector<1x128xf32> to vector<128xf32>
    %52 = vector.shape_cast %51 : vector<128xf32> to vector<1x1x128xf32>
    %53 = vector.broadcast %52 : vector<1x1x128xf32> to vector<1x16x128xf32>
    %54 = arith.mulf %49, %53 : vector<1x16x128xf32>
    %55 = arith.addf %48, %54 : vector<1x16x128xf32>
    %c0_31 = arith.constant 0 : index
    %c9 = arith.constant 9 : index
    %c0_32 = arith.constant 0 : index
    %56 = vector.load %arg11[%c0_31, %c9, %c0_32] : memref<1x32x128xf32, #tpu.memory_space<vmem>>, vector<1x16x128xf32>
    %57 = vector.extract_strided_slice %4 {offsets = [5, 0], sizes = [1, 128], strides = [1, 1]} : vector<9x128xf32> to vector<1x128xf32>
    %58 = vector.shape_cast %57 : vector<1x128xf32> to vector<128xf32>
    %59 = vector.shape_cast %58 : vector<128xf32> to vector<1x1x128xf32>
    %60 = vector.broadcast %59 : vector<1x1x128xf32> to vector<1x16x128xf32>
    %61 = arith.mulf %56, %60 : vector<1x16x128xf32>
    %62 = arith.addf %55, %61 : vector<1x16x128xf32>
    %c0_33 = arith.constant 0 : index
    %c10 = arith.constant 10 : index
    %c0_34 = arith.constant 0 : index
    %63 = vector.load %arg11[%c0_33, %c10, %c0_34] : memref<1x32x128xf32, #tpu.memory_space<vmem>>, vector<1x16x128xf32>
    %64 = vector.extract_strided_slice %4 {offsets = [6, 0], sizes = [1, 128], strides = [1, 1]} : vector<9x128xf32> to vector<1x128xf32>
    %65 = vector.shape_cast %64 : vector<1x128xf32> to vector<128xf32>
    %66 = vector.shape_cast %65 : vector<128xf32> to vector<1x1x128xf32>
    %67 = vector.broadcast %66 : vector<1x1x128xf32> to vector<1x16x128xf32>
    %68 = arith.mulf %63, %67 : vector<1x16x128xf32>
    %69 = arith.addf %62, %68 : vector<1x16x128xf32>
    %c0_35 = arith.constant 0 : index
    %c11 = arith.constant 11 : index
    %c0_36 = arith.constant 0 : index
    %70 = vector.load %arg11[%c0_35, %c11, %c0_36] : memref<1x32x128xf32, #tpu.memory_space<vmem>>, vector<1x16x128xf32>
    %71 = vector.extract_strided_slice %4 {offsets = [7, 0], sizes = [1, 128], strides = [1, 1]} : vector<9x128xf32> to vector<1x128xf32>
    %72 = vector.shape_cast %71 : vector<1x128xf32> to vector<128xf32>
    %73 = vector.shape_cast %72 : vector<128xf32> to vector<1x1x128xf32>
    %74 = vector.broadcast %73 : vector<1x1x128xf32> to vector<1x16x128xf32>
    %75 = arith.mulf %70, %74 : vector<1x16x128xf32>
    %76 = arith.addf %69, %75 : vector<1x16x128xf32>
    %c0_37 = arith.constant 0 : index
    %c12 = arith.constant 12 : index
    %c0_38 = arith.constant 0 : index
    %77 = vector.load %arg11[%c0_37, %c12, %c0_38] : memref<1x32x128xf32, #tpu.memory_space<vmem>>, vector<1x16x128xf32>
    %78 = vector.extract_strided_slice %4 {offsets = [8, 0], sizes = [1, 128], strides = [1, 1]} : vector<9x128xf32> to vector<1x128xf32>
    %79 = vector.shape_cast %78 : vector<1x128xf32> to vector<128xf32>
    %80 = vector.shape_cast %79 : vector<128xf32> to vector<1x1x128xf32>
    %81 = vector.broadcast %80 : vector<1x1x128xf32> to vector<1x16x128xf32>
    %82 = arith.mulf %77, %81 : vector<1x16x128xf32>
    %83 = arith.addf %76, %82 : vector<1x16x128xf32>
    %c0_39 = arith.constant 0 : index
    %c8_40 = arith.constant 8 : index
    %c0_41 = arith.constant 0 : index
    %84 = vector.load %arg11[%c0_39, %c8_40, %c0_41] : memref<1x32x128xf32, #tpu.memory_space<vmem>>, vector<1x16x128xf32>
    %85 = vector.broadcast %7 : vector<1x1x128xf32> to vector<1x16x128xf32>
    %86 = arith.addf %83, %85 : vector<1x16x128xf32>
    %cst = arith.constant 5.000000e-01 : f32
    %87 = vector.broadcast %cst : f32 to vector<1x16x128xf32>
    %88 = arith.mulf %87, %86 : vector<1x16x128xf32>
    %cst_42 = arith.constant 4.471500e-02 : f32
    %89 = vector.broadcast %cst_42 : f32 to vector<1x16x128xf32>
    %90 = arith.mulf %89, %86 : vector<1x16x128xf32>
    %91 = arith.mulf %90, %86 : vector<1x16x128xf32>
    %92 = arith.mulf %91, %86 : vector<1x16x128xf32>
    %93 = arith.addf %86, %92 : vector<1x16x128xf32>
    %cst_43 = arith.constant 0.797884583 : f32
    %94 = vector.broadcast %cst_43 : f32 to vector<1x16x128xf32>
    %95 = arith.mulf %94, %93 : vector<1x16x128xf32>
    %96 = math.tanh %95 : vector<1x16x128xf32>
    %cst_44 = arith.constant 1.000000e+00 : f32
    %97 = vector.broadcast %cst_44 : f32 to vector<1x16x128xf32>
    %98 = arith.addf %97, %96 : vector<1x16x128xf32>
    %99 = arith.mulf %88, %98 : vector<1x16x128xf32>
    %100 = vector.broadcast %10 : vector<1x1x128xf32> to vector<1x16x128xf32>
    %101 = arith.mulf %99, %100 : vector<1x16x128xf32>
    %102 = vector.broadcast %13 : vector<1x1x128xf32> to vector<1x16x128xf32>
    %103 = arith.addf %101, %102 : vector<1x16x128xf32>
    %104 = arith.addf %103, %84 : vector<1x16x128xf32>
    %105 = vector.shape_cast %104 : vector<1x16x128xf32> to vector<16x128xf32>
    %106 = arith.truncf %105 : vector<16x128xf32> to vector<16x128xbf16>
    %cst_45 = arith.constant dense<0.000000e+00> : vector<16x128xf32>
    %107 = tpu.matmul %106, %21, %cst_45 {dimension_numbers = #tpu.dot_dimension_numbers<[1], [0], [0], [1], [0, 0, 1, 1], [], []>} : vector<16x128xbf16>, vector<128x128xbf16>, vector<16x128xf32> -> vector<16x128xf32>
    %108 = vector.broadcast %15 : vector<1x128xf32> to vector<16x128xf32>
    %109 = arith.addf %107, %108 : vector<16x128xf32>
    %cst_46 = arith.constant 5.000000e-01 : f32
    %110 = vector.broadcast %cst_46 : f32 to vector<16x128xf32>
    %111 = arith.mulf %110, %109 : vector<16x128xf32>
    %cst_47 = arith.constant 4.471500e-02 : f32
    %112 = vector.broadcast %cst_47 : f32 to vector<16x128xf32>
    %113 = arith.mulf %112, %109 : vector<16x128xf32>
    %114 = arith.mulf %113, %109 : vector<16x128xf32>
    %115 = arith.mulf %114, %109 : vector<16x128xf32>
    %116 = arith.addf %109, %115 : vector<16x128xf32>
    %cst_48 = arith.constant 0.797884583 : f32
    %117 = vector.broadcast %cst_48 : f32 to vector<16x128xf32>
    %118 = arith.mulf %117, %116 : vector<16x128xf32>
    %119 = math.tanh %118 : vector<16x128xf32>
    %cst_49 = arith.constant 1.000000e+00 : f32
    %120 = vector.broadcast %cst_49 : f32 to vector<16x128xf32>
    %121 = arith.addf %120, %119 : vector<16x128xf32>
    %122 = arith.mulf %111, %121 : vector<16x128xf32>
    %123 = vector.broadcast %17 : vector<1x128xf32> to vector<16x128xf32>
    %124 = arith.mulf %122, %123 : vector<16x128xf32>
    %125 = vector.broadcast %19 : vector<1x128xf32> to vector<16x128xf32>
    %126 = arith.addf %124, %125 : vector<16x128xf32>
    %127 = vector.shape_cast %126 : vector<16x128xf32> to vector<1x16x128xf32>
    %c0_50 = arith.constant 0 : index
    %c8_51 = arith.constant 8 : index
    %c0_52 = arith.constant 0 : index
    %128 = vector.load %arg11[%c0_50, %c8_51, %c0_52] : memref<1x32x128xf32, #tpu.memory_space<vmem>>, vector<1x16x128xf32>
    tpu.vector_store %arg11[%c0_50, %c8_51, %c0_52], %127 {strides = array<i32>} : memref<1x32x128xf32, #tpu.memory_space<vmem>>, vector<1x16x128xf32>,
    %c1_i32 = arith.constant 1 : i32
    %129 = arith.cmpi eq, %arg1, %c1_i32 : i32
    %130 = arith.extui %129 : i1 to i32
    %c0_i32_53 = arith.constant 0 : i32
    %131 = arith.cmpi ne, %130, %c0_i32_53 : i32
    scf.if %131 {
      %c0_54 = arith.constant 0 : index
      %c8_55 = arith.constant 8 : index
      %c0_56 = arith.constant 0 : index
      %132 = vector.load %arg11[%c0_54, %c8_55, %c0_56] : memref<1x32x128xf32, #tpu.memory_space<vmem>>, vector<1x16x128xf32>
      %cst_57 = arith.constant dense<0.000000e+00> : vector<1x128xf32>
      %133 = vector.multi_reduction <add>, %132, %cst_57 [1] : vector<1x16x128xf32> to vector<1x128xf32>
      %cst_58 = arith.constant 1.600000e+01 : f32
      %134 = vector.broadcast %cst_58 : f32 to vector<1x128xf32>
      %135 = arith.divf %133, %134 : vector<1x128xf32>
      %136 = arith.truncf %135 : vector<1x128xf32> to vector<1x128xbf16>
      %c0_59 = arith.constant 0 : index
      %c0_60 = arith.constant 0 : index
      %137 = vector.load %arg8[%c0_59, %c0_60] : memref<128x128xbf16, #tpu.memory_space<vmem>>, vector<128x128xbf16>
      %cst_61 = arith.constant dense<0.000000e+00> : vector<1x128xf32>
      %138 = tpu.matmul %136, %137, %cst_61 {dimension_numbers = #tpu.dot_dimension_numbers<[1], [0], [0], [1], [0, 0, 1, 1], [], []>} : vector<1x128xbf16>, vector<128x128xbf16>, vector<1x128xf32> -> vector<1x128xf32>
      %c0_62 = arith.constant 0 : index
      %c0_63 = arith.constant 0 : index
      %139 = vector.load %arg9[%c0_62, %c0_63] : memref<1x128xf32, #tpu.memory_space<vmem>>, vector<1x128xf32>
      %140 = arith.addf %138, %139 : vector<1x128xf32>
      %cst_64 = arith.constant 0.000000e+00 : f32
      %141 = vector.broadcast %cst_64 : f32 to vector<1x128xf32>
      %142 = arith.cmpf oge, %140, %141 : vector<1x128xf32>
      %cst_65 = arith.constant 0.00999999977 : f32
      %143 = vector.broadcast %cst_65 : f32 to vector<1x128xf32>
      %144 = arith.mulf %143, %140 : vector<1x128xf32>
      %145 = arith.select %142, %140, %144 : vector<1x128xi1>, vector<1x128xf32>
      %c0_66 = arith.constant 0 : index
      %c0_67 = arith.constant 0 : index
      %c0_68 = arith.constant 0 : index
      %146 = vector.load %arg10[%c0_66, %c0_67, %c0_68] : memref<1x1x128xf32, #tpu.memory_space<vmem>>, vector<1x1x128xf32>
      %147 = vector.shape_cast %146 : vector<1x1x128xf32> to vector<1x128xf32>
      %148 = vector.shape_cast %145 : vector<1x128xf32> to vector<1x1x128xf32>
      tpu.vector_store %arg10[%c0_66, %c0_67, %c0_68], %148 {strides = array<i32>} : memref<1x1x128xf32, #tpu.memory_space<vmem>>, vector<1x1x128xf32>,
    } else {
    }
    return
  }
  func.func @transform_0(%arg0: i32, %arg1: i32) -> (i32, i32, i32) {
    %c0_i32 = arith.constant 0 : i32
    %c0_i32_0 = arith.constant 0 : i32
    %c0_i32_1 = arith.constant 0 : i32
    return %arg0, %c0_i32, %c0_i32_0 : i32, i32, i32
  }
  func.func @transform_1(%arg0: i32, %arg1: i32) -> (i32, i32) {
    %c0_i32 = arith.constant 0 : i32
    %c0_i32_0 = arith.constant 0 : i32
    %c0_i32_1 = arith.constant 0 : i32
    return %c0_i32, %c0_i32_0 : i32, i32
  }
  func.func @transform_2(%arg0: i32, %arg1: i32) -> (i32, i32) {
    %c0_i32 = arith.constant 0 : i32
    %c0_i32_0 = arith.constant 0 : i32
    %c0_i32_1 = arith.constant 0 : i32
    return %c0_i32, %c0_i32_0 : i32, i32
  }
  func.func @transform_3(%arg0: i32, %arg1: i32) -> (i32, i32, i32) {
    %c0_i32 = arith.constant 0 : i32
    %c0_i32_0 = arith.constant 0 : i32
    %c0_i32_1 = arith.constant 0 : i32
    return %arg1, %c0_i32, %c0_i32_0 : i32, i32, i32
  }
  func.func @transform_4(%arg0: i32, %arg1: i32) -> (i32, i32, i32) {
    %c0_i32 = arith.constant 0 : i32
    %c0_i32_0 = arith.constant 0 : i32
    %c0_i32_1 = arith.constant 0 : i32
    return %arg1, %c0_i32, %c0_i32_0 : i32, i32, i32
  }
  func.func @transform_5(%arg0: i32, %arg1: i32) -> (i32, i32, i32) {
    %c0_i32 = arith.constant 0 : i32
    %c0_i32_0 = arith.constant 0 : i32
    %c0_i32_1 = arith.constant 0 : i32
    return %arg1, %c0_i32, %c0_i32_0 : i32, i32, i32
  }
  func.func @transform_6(%arg0: i32, %arg1: i32) -> (i32, i32) {
    %c0_i32 = arith.constant 0 : i32
    %c0_i32_0 = arith.constant 0 : i32
    %c0_i32_1 = arith.constant 0 : i32
    return %c0_i32, %c0_i32_0 : i32, i32
  }
  func.func @transform_7(%arg0: i32, %arg1: i32) -> (i32, i32) {
    %c0_i32 = arith.constant 0 : i32
    %c0_i32_0 = arith.constant 0 : i32
    %c0_i32_1 = arith.constant 0 : i32
    return %c0_i32, %c0_i32_0 : i32, i32
  }
  func.func @transform_8(%arg0: i32, %arg1: i32) -> (i32, i32, i32) {
    %c0_i32 = arith.constant 0 : i32
    %c0_i32_0 = arith.constant 0 : i32
    %c0_i32_1 = arith.constant 0 : i32
    return %arg0, %c0_i32, %c0_i32_0 : i32, i32, i32
  }
}

</mosaic_0001>

<bundles_post_ra>
// kernel: subject_classifier_forward.1
= control target key start
LH: loop header
LB: loop body
LE: loop exit
PB: predicated region body
PF: predicated region fallthrough
CT: control target
= control target key end

     0   :  { %13 = vsyncpa [#allocation4], 0  ;;  %s1573_s0 = inlined_call_operand.vmem [shape: f32[2,16,16], index: 0, kind: input, shape index: {}]   ;;  %s1574_s1 = inlined_call_operand.vmem [shape: bf16[16,128], index: 1, kind: input, shape index: {}]   ;;  %s1575_s2 = inlined_call_operand.vmem [shape: f32[3,128], index: 2, kind: input, shape index: {}]   ;;  %s1576_s3 = inlined_call_operand.vmem [shape: f32[2,9,128], index: 3, kind: input, shape index: {}]   ;;  %s1577_s4 = inlined_call_operand.vmem [shape: f32[2,6,128], index: 4, kind: input, shape index: {}]   ;;  %s1578_s5 = inlined_call_operand.vmem [shape: bf16[2,128,128], index: 5, kind: input, shape index: {}]   ;;  %s1579_s6 = inlined_call_operand.vmem [shape: bf16[128,128], index: 6, kind: input, shape index: {}]   ;;  %s1580_s7 = inlined_call_operand.vmem [shape: f32[1,128], index: 7, kind: input, shape index: {}]   ;;  %s1581_s8 = inlined_call_operand.hbm [shape: f32[2,1,128], index: 8, kind: output, shape index: {}]  }
   0x1   :  { %15 = vsyncpa [#allocation4 + $0x1], 0  ;;  %s1355_s27 = smov 0   ;;  %s1357_s28 = smov 0  }
   0x2   :  { %s1359_s29 = smov 0   ;;  %s1361_s30 = smov 0  }
   0x3   :  { %s1363_s9 = smov 0   ;;  %s1365_s10 = smov 0  }
   0x4   :  { %s1367_s11 = smov 0   ;;  %s1369_s12 = smov 0  }
   0x5 LB: > { %1588 = sst [smem:[#allocation6_spill]] %s1273_s27  ;;  %s989_s13 = sadd.s32 4294967295, %s1301_s12   ;;  %s1301_s12 = sphi %s1369_s12, %s21_s12   ;;  %s1297_s11 = sphi %s1367_s11, %s1607_s11   ;;  %s1293_s10 = sphi %s1365_s10, %s1606_s10   ;;  %s1289_s9 = sphi %s1363_s9, %s1605_s9   ;;  %s1285_s30 = sphi %s1361_s30, %s1604_s30   ;;  %s1281_s29 = sphi %s1359_s29, %s1603_s29   ;;  %s1277_s28 = sphi %s1357_s28, %s1609_s28   ;;  %s1273_s27 = sphi %s1355_s27, %s1608_s27  }
   0x6   : > { %1589 = sst [smem:[#allocation7_spill]] %s1281_s29  ;;  %s990_s14 = sadd.s32 4294967294, %s1301_s12  }
   0x7   : > { %1590 = sst [smem:[#allocation8_spill]] %s1293_s10  ;;  %s30_s15 = sadd.s32 1, %s1293_s10 }
   0x8   : > { %1591 = sst [smem:[#allocation9_spill]] %s1297_s11  ;;  %p31_p0 = scmp.ge.s32.totalorder %s30_s15, 2 }
   0x9   : > { %s33_s16 = sadd.s32 1, %s1297_s11  ;;  %p238_p1 = scmp.ne.s32.totalorder %s1281_s29, %s1277_s28 }
   0xa   : > { %p239_p2 = scmp.eq.s32.totalorder %s989_s13, 3  ;;  %s1611_s15 = smov (%p31_p0, %s30_s15), 0 }
   0xb   : > { %1592 = sst [smem:[#allocation10_spill]] %s1611_s15  ;;  %s1613_s16 = smov (!%p31_p0, %s33_s16), %s1297_s11 }
   0xc   : > { %p1404_p3 = por %p239_p2, %p238_p1  ;;  %p244_p4 = scmp.ne.s32.totalorder %s1277_s28, %s1273_s27 }
   0xd   : > { %p35_p5 = scmp.ge.s32.totalorder %s1613_s16, 2  ;;  %p245_p6 = scmp.eq.s32.totalorder %s990_s14, 3 }
   0xe   : > { %p993_p7 = scmp.ge.s32.totalorder %s1301_s12, 1  ;;  %p306_p8 = scmp.lt.s32.totalorder %s1301_s12, 5 }
   0xf   : > { %s1615_s16 = smov (%p35_p5, %s1613_s16), 0  ;;  %p1414_p9 = por %p245_p6, %p244_p4 }
  0x10   : > { %1594 = sst [smem:[#allocation11_spill]] %s1615_s16  ;;  %p307_p10 = pnand %p993_p7, %p306_p8 }
  0x11   : > { %s1595_s18 = scalar_select %p1414_p9, 1, 0 }
  0x12   : > { %s225_s19 = ssub.s32 %s1297_s11, %s1615_s16  ;;  %s228_s20 = sadd.s32 1, %s1281_s29 }
  0x13   : > { %1596 = sst [smem:[#allocation12_spill]] %s1595_s18  ;;  %p226_p11 = scmp.eq.s32.totalorder %s225_s19, 0 }
  0x14   : > { %310 = sbr.rel (%p307_p10) target bundleno = 822 (0x336), region = 52  ;;  %p353_p12 = scmp.lt.s32.totalorder (!%p307_p10), %s1289_s9, 1 }
  0x15   : > { %s1422_s21 = scalar_select %p226_p11, %s1281_s29, %s228_s20  }
  0x16   : > { %p358_p13 = scmp.lt.s32.totalorder (!%p307_p10), %s1285_s30, 1  ;;  %s1598_s26 = sand.u32 (!%p307_p10), 1, %s1277_s28  }
  0x17   : > { %1597 = sst [smem:[#allocation13_spill]] %s1422_s21  ;;  %p1001_p0 = scmp.ne.s32.totalorder (!%p307_p10), %s1285_s30, 0 }
  0x19   : > { %s354_s23 = scalar_select %p353_p12, %s1289_s9, 1 }
  0x1a   : > { %s359_s24 = scalar_select %p358_p13, %s1285_s30, 1 }
  0x1b   : > { %s1034_s25 = sshll.u32 %s354_s23, 4  ;;  %376 = sbr.rel (%p1001_p0) target bundleno = 269 (0x10d), region = 56 }
  0x1c   : > { %s357_s14 = scalar_lea.vmem %s1573_s0, %s1034_s25  ;;  %s1035_s19 = sshll.u32 %s359_s24, 4 }
  0x1d   : > { %s1435_s15 = scalar_lea.vmem %s1576_s3, %s1035_s19  ;;  %s998_s11 = sshll.u32 %s359_s24, 3 }
  0x1e   : > { %s1440_s22 = scalar_lea.vmem %s1577_s4, %s998_s11  ;;  %s1036_s29 = sshll.u32 %s359_s24, 6 }
  0x1f   : > { %s1445_s23 = scalar_lea.vmem %s1578_s5, %s1036_s29  ;;  %s1449_s25 = scalar_lea.vmem [#allocation3], %s1598_s26 }
  0x20   : > { %v1180_v0 = vld [vmem:[%s1574_s1] sm:$0xff]   ;;  %v1303_v1 = vmov 0.0   ;;  %v380_v3 = vld [vmem:[%s357_s14 + $0x8] sm:$0xff]  ;;  %vm1304_vm0 = vmmov 0   ;;  %vm395_vm1 = vcmask 130048  }
  0x21   : > { %377 = vst [vmem:[#allocation2] sm:$0xff] %v1303_v1  ;;  %378 = vst [vmem:[#allocation2 + $0x18] sm:$0xff] %v1303_v1  ;;  %1057 = vmatprep.subr.bf16.mxu0 %v1303_v1  ;;  %v379_v2 = vld [vmem:[%s357_s14] sm:$0xff]  ;;  %1059 = vmatprep.mubr.msk.bf16.mxu0 %vm1304_vm0, %v1303_v1 }
  0x22   : > { %1058 = vmatpush3.bf16.msra.mxu0 %v1180_v0  ;;  %v381_v4 = vpack.c.bf16 %v380_v3, %v379_v2  ;;  %v1002_v5 = vld [vmem:[%s1575_s2] ss:$0 sm:$0xff]  ;;  %v1005_v25 = vld [vmem:[%s1575_s2 + $0x1] ss:$0 sm:$0xff]  ;;  %v1006_v28 = vld [vmem:[%s1575_s2 + $0x2] ss:$0 sm:$0xff] }
  0x25   : > { %1060 = vmatmul.mubr.msk.bf16.vlgmr.msra.gmra.mxu0 %vm395_vm1, %v381_v4 }
  0xe5   : > { %v433_v6 = vpop.f32.mrf.mxu0 }
  0xe6   : > { %v434_v7 = vadd.f32 %v1002_v5, %v433_v6 }
  0xe7   : > { %v1061_v8 = vpop.f32.mrf.mxu0 }
  0xe8   : > { %v442_v9 = vmul.f32 0.044715, %v434_v7  ;;  %v440_v23 = vmul.f32 0.5, %v434_v7 }
  0xe9   : > { %v436_v10 = vpop.f32.mrf.mxu0 }
  0xea   : > { %v444_v11 = vmul.f32 %v442_v9, %v434_v7  ;;  %v437_v12 = vadd.f32 %v1002_v5, %v436_v10 }
  0xeb   : > { %v1062_v13 = vpop.f32.mrf.mxu0 }
  0xec   : > { %v446_v14 = vmul.f32 %v444_v11, %v434_v7  ;;  %v443_v15 = vmul.f32 0.044715, %v437_v12  ;;  %v441_v30 = vmul.f32 0.5, %v437_v12 }
  0xee   : > { %v448_v16 = vadd.f32 %v446_v14, %v434_v7  ;;  %v445_v17 = vmul.f32 %v443_v15, %v437_v12 }
  0xf0   : > { %v450_v18 = vmul.f32 0.7978846, %v448_v16  ;;  %v447_v19 = vmul.f32 %v445_v17, %v437_v12 }
  0xf2   : > { %1181 = vtanh.f32 %v450_v18  ;;  %v449_v20 = vadd.f32 %v447_v19, %v437_v12 }
  0xf4   : > { %v451_v21 = vmul.f32 0.7978846, %v449_v20 }
  0xf6   : > { %1183 = vtanh.f32 %v451_v21 }
  0xff   : > { %v1182_v22 = vpop.eup %1181 }
 0x100   : > { %v454_v24 = vadd.f32 1.0, %v1182_v22 }
 0x102   : > { %v456_v26 = vmul.f32 %v454_v24, %v440_v23 }
 0x103   : > { %v1184_v27 = vpop.eup %1183 }
 0x104   : > { %v463_v29 = vmul.f32 %v1005_v25, %v456_v26  ;;  %v455_v31 = vadd.f32 1.0, %v1184_v27 }
 0x106   : > { %v470_v32 = vadd.f32 %v1006_v28, %v463_v29  ;;  %v457_v33 = vmul.f32 %v455_v31, %v441_v30 }
 0x108   : > { %472 = vst [vmem:[#allocation2 + $0x8] sm:$0xff] %v470_v32  ;;  %v464_v34 = vmul.f32 %v1005_v25, %v457_v33 }
 0x10a   : > { %v471_v35 = vadd.f32 %v1006_v28, %v464_v34 }
 0x10c   : > { %473 = vst [vmem:[#allocation2 + $0x10] sm:$0xff] %v471_v35 }
 0x10d PF: > { %v1185_v36 = vld [vmem:[%s1445_s23 + $0x38] sm:$0xff]   ;;  %v500_v37 = vlaneseq  ;;  %v1305_v38 = vmov 0.0   ;;  %v1186_v39 = vld [vmem:[%s1445_s23 + $0x30] sm:$0xff]   ;;  %vm1306_vm2 = vmmov 0   ;;  %v1187_v43 = vld [vmem:[%s1445_s23 + $0x28] sm:$0xff]   ;;  %p1022_p1 = scmp.ne.s32.totalorder %s1285_s30, 1 }
 0x10e   : > { %1063 = vmatprep.subr.bf16.mxu0 %v1305_v38  ;;  %1079 = vmatprep.mubr.msk.bf16.mxu0 %vm1306_vm2, %v1305_v38  ;;  %v474_v46 = vld [vmem:[%s1435_s15] sm:$0xff]  ;;  %v1189_v15 = vld [vmem:[%s1445_s23 + $0x18] sm:$0xff]   ;;  %v1190_v29 = vld [vmem:[%s1445_s23 + $0x10] sm:$0xff]  }
 0x10f   : > { %1064 = vmatpush3.bf16.msra.mxu0 %v1185_v36  ;;  %v501_v40 = vshrl.u32 %v500_v37, 7  ;;  %v1188_v48 = vld [vmem:[%s1445_s23 + $0x20] sm:$0xff]   ;;  %v1474_v6 = vld [vmem:[#allocation2 + $0x8] sm:$0xff] }
 0x110   : > { %1065 = vmatprep.subr.bf16.mxu0 %v1305_v38  ;;  %v498_v49 = vld [vmem:[#allocation2 + $0x4] sm:$0xff] }
 0x111   : > { %v502_v41 = vsub.s32 0, %v501_v40  ;;  %v510_v42 = vsub.s32 1, %v501_v40  ;;  %v520_v44 = vsub.s32 2, %v501_v40  ;;  %v530_v45 = vsub.s32 3, %v501_v40  ;;  %v506_v55 = vld [vmem:[#allocation2 + $0x5] sm:$0xff] }
 0x112   : > { %v540_v47 = vsub.s32 4, %v501_v40  ;;  %v550_v58 = vsub.s32 5, %v501_v40  ;;  %v560_v59 = vsub.s32 6, %v501_v40  ;;  %v516_v0 = vld [vmem:[#allocation2 + $0x6] sm:$0xff]  ;;  %v570_v9 = vsub.s32 7, %v501_v40 }
 0x113   : > { %1066 = vmatpush3.bf16.msra.mxu0 %v1186_v39  ;;  %v503_v50 = vrot.slane %v474_v46, %v502_v41  ;;  %v511_v51 = vrot.slane %v474_v46, %v510_v42  ;;  %v521_v52 = vrot.slane %v474_v46, %v520_v44  ;;  %v531_v53 = vrot.slane %v474_v46, %v530_v45  ;;  %v499_v54 = vld [vmem:[#allocation2 + $0xc] sm:$0xff]  ;;  %v1007_v36 = vld [vmem:[%s1435_s15 + $0x8] ss:$0 sm:$0xff]  ;;  %v576_v37 = vld [vmem:[#allocation2 + $0x14] sm:$0xff] }
 0x114   : > { %1067 = vmatprep.subr.bf16.mxu0 %v1305_v38  ;;  %v507_v56 = vld [vmem:[#allocation2 + $0xd] sm:$0xff]  ;;  %v541_v57 = vrot.slane %v474_v46, %v540_v47  ;;  %v551_v8 = vrot.slane %v474_v46, %v550_v58  ;;  %v561_v21 = vrot.slane %v474_v46, %v560_v59  ;;  %v571_v28 = vrot.slane %v474_v46, %v570_v9 }
 0x115   : > { %v504_v60 = vmul.f32 %v503_v50, %v498_v49  ;;  %v505_v61 = vmul.f32 %v503_v50, %v499_v54  ;;  %v512_v62 = vmul.f32 %v511_v51, %v506_v55  ;;  %v513_v63 = vmul.f32 %v511_v51, %v507_v56  ;;  %v517_v1 = vld [vmem:[#allocation2 + $0xe] sm:$0xff]  ;;  %v1192_v50 = vld [vmem:[%s1445_s23] sm:$0xff]  }
 0x116   : > { %v526_v2 = vld [vmem:[#allocation2 + $0x7] sm:$0xff]  ;;  %v522_v3 = vmul.f32 %v521_v52, %v516_v0  ;;  %v523_v4 = vmul.f32 %v521_v52, %v517_v1  ;;  %v527_v5 = vld [vmem:[#allocation2 + $0xf] sm:$0xff]  ;;  %v542_v16 = vmul.f32 %v541_v57, %v1474_v6  ;;  %v581_v46 = vmul.f32 %v1007_v36, %v499_v54  ;;  %v1008_v51 = vld [vmem:[%s1440_s22] ss:$0 sm:$0xff] }
 0x117   : > { %1068 = vmatpush3.bf16.msra.mxu0 %v1187_v43  ;;  %v1476_v7 = vld [vmem:[#allocation2 + $0x10] sm:$0xff]  ;;  %v514_v10 = vadd.f32 %v512_v62, %v504_v60  ;;  %v515_v11 = vadd.f32 %v513_v63, %v505_v61  ;;  %v532_v12 = vmul.f32 %v531_v53, %v526_v2  ;;  %v533_v13 = vmul.f32 %v531_v53, %v527_v5  ;;  %v1191_v43 = vld [vmem:[%s1445_s23 + $0x8] sm:$0xff]  }
 0x118   : > { %1069 = vmatprep.subr.bf16.mxu0 %v1305_v38  ;;  %v546_v14 = vld [vmem:[#allocation2 + $0x9] sm:$0xff]  ;;  %v547_v17 = vld [vmem:[#allocation2 + $0x11] sm:$0xff]  ;;  %v543_v20 = vmul.f32 %v541_v57, %v1476_v7  ;;  %v582_v47 = vmul.f32 %v1007_v36, %v576_v37 }
 0x119   : > { %v524_v18 = vadd.f32 %v522_v3, %v514_v10  ;;  %v525_v19 = vadd.f32 %v523_v4, %v515_v11  ;;  %v552_v22 = vmul.f32 %v551_v8, %v546_v14  ;;  %v556_v23 = vld [vmem:[#allocation2 + $0xa] sm:$0xff]  ;;  %v557_v24 = vld [vmem:[#allocation2 + $0x12] sm:$0xff]  ;;  %v553_v27 = vmul.f32 %v551_v8, %v547_v17  ;;  %v1009_v8 = vld [vmem:[%s1440_s22 + $0x1] ss:$0 sm:$0xff] }
 0x11a   : > { %v566_v30 = vld [vmem:[#allocation2 + $0xb] sm:$0xff]  ;;  %v567_v31 = vld [vmem:[#allocation2 + $0x13] sm:$0xff]  ;;  %v562_v34 = vmul.f32 %v561_v21, %v556_v23  ;;  %v563_v35 = vmul.f32 %v561_v21, %v557_v24  ;;  %v1010_v11 = vld [vmem:[%s1440_s22 + $0x2] ss:$0 sm:$0xff] }
 0x11b   : > { %1070 = vmatpush3.bf16.msra.mxu0 %v1188_v48  ;;  %v534_v25 = vadd.f32 %v532_v12, %v524_v18  ;;  %v535_v26 = vadd.f32 %v533_v13, %v525_v19  ;;  %v572_v41 = vmul.f32 %v571_v28, %v566_v30  ;;  %v573_v42 = vmul.f32 %v571_v28, %v567_v31 }
 0x11c   : > { %1071 = vmatprep.subr.bf16.mxu0 %v1305_v38 }
 0x11d   : > { %v544_v32 = vadd.f32 %v542_v16, %v534_v25  ;;  %v545_v33 = vadd.f32 %v543_v20, %v535_v26  ;;  %v1011_v20 = vld [vmem:[%s1440_s22 + $0x3] ss:$0 sm:$0xff] }
 0x11f   : > { %1072 = vmatpush3.bf16.msra.mxu0 %v1189_v15  ;;  %v554_v39 = vadd.f32 %v552_v22, %v544_v32  ;;  %v555_v40 = vadd.f32 %v553_v27, %v545_v33 }
 0x120   : > { %1073 = vmatprep.subr.bf16.mxu0 %v1305_v38 }
 0x121   : > { %v564_v44 = vadd.f32 %v562_v34, %v554_v39  ;;  %v565_v45 = vadd.f32 %v563_v35, %v555_v40  ;;  %v1020_v39 = vld [vmem:[%s1440_s22 + $0x4] ss:$0 sm:$0xff] }
 0x123   : > { %1074 = vmatpush3.bf16.msra.mxu0 %v1190_v29  ;;  %v574_v48 = vadd.f32 %v572_v41, %v564_v44  ;;  %v575_v49 = vadd.f32 %v573_v42, %v565_v45  ;;  %v1021_v42 = vld [vmem:[%s1440_s22 + $0x5] ss:$0 sm:$0xff] }
 0x124   : > { %1075 = vmatprep.subr.bf16.mxu0 %v1305_v38 }
 0x125   : > { %v583_v52 = vadd.f32 %v581_v46, %v574_v48  ;;  %v584_v53 = vadd.f32 %v582_v47, %v575_v49 }
 0x127   : > { %1076 = vmatpush3.bf16.msra.mxu0 %v1191_v43  ;;  %v589_v55 = vadd.f32 %v1008_v51, %v583_v52  ;;  %v590_v56 = vadd.f32 %v1008_v51, %v584_v53 }
 0x128   : > { %1077 = vmatprep.subr.bf16.mxu0 %v1305_v38 }
 0x129   : > { %v593_v57 = vmul.f32 0.044715, %v589_v55  ;;  %v594_v58 = vmul.f32 0.044715, %v590_v56  ;;  %v591_v38 = vmul.f32 0.5, %v589_v55  ;;  %v592_v3 = vmul.f32 0.5, %v590_v56 }
 0x12b   : > { %1078 = vmatpush3.bf16.msra.mxu0 %v1192_v50  ;;  %v595_v59 = vmul.f32 %v593_v57, %v589_v55  ;;  %v596_v60 = vmul.f32 %v594_v58, %v590_v56 }
 0x12d   : > { %v597_v61 = vmul.f32 %v595_v59, %v589_v55  ;;  %v598_v54 = vmul.f32 %v596_v60, %v590_v56 }
 0x12f   : > { %v599_v62 = vadd.f32 %v597_v61, %v589_v55  ;;  %v600_v63 = vadd.f32 %v598_v54, %v590_v56 }
 0x131   : > { %v601_v0 = vmul.f32 0.7978846, %v599_v62  ;;  %v602_v1 = vmul.f32 0.7978846, %v600_v63 }
 0x133   : > { %1193 = vtanh.f32 %v601_v0 }
 0x134   : > { %1195 = vtanh.f32 %v602_v1 }
 0x140   : > { %v1194_v2 = vpop.eup %1193 }
 0x141   : > { %v1196_v4 = vpop.eup %1195  ;;  %v605_v5 = vadd.f32 1.0, %v1194_v2 }
 0x142   : > { %v606_v9 = vadd.f32 1.0, %v1196_v4 }
 0x143   : > { %v607_v10 = vmul.f32 %v605_v5, %v591_v38 }
 0x144   : > { %v608_v12 = vmul.f32 %v606_v9, %v592_v3 }
 0x145   : > { %v613_v13 = vmul.f32 %v1009_v8, %v607_v10 }
 0x146   : > { %v614_v14 = vmul.f32 %v1009_v8, %v608_v12 }
 0x147   : > { %v619_v15 = vadd.f32 %v1010_v11, %v613_v13 }
 0x148   : > { %v620_v16 = vadd.f32 %v1010_v11, %v614_v14 }
 0x149   : > { %v621_v17 = vadd.f32 %v619_v15, %v1474_v6 }
 0x14a   : > { %v622_v18 = vadd.f32 %v620_v16, %v1476_v7 }
 0x14c   : > { %v623_v19 = vpack.c.bf16 %v622_v18, %v621_v17 }
 0x14e   : > { %1080 = vmatmul.mubr.bf16.vlgmr.msra.gmra.mxu0 %v623_v19 }
 0x20e   : > { %v710_v21 = vpop.f32.mrf.mxu0 }
 0x20f   : > { %v711_v22 = vadd.f32 %v1011_v20, %v710_v21 }
 0x210   : > { %v1081_v23 = vpop.f32.mrf.mxu0 }
 0x211   : > { %v719_v24 = vmul.f32 0.044715, %v711_v22  ;;  %v717_v36 = vmul.f32 0.5, %v711_v22 }
 0x212   : > { %v713_v25 = vpop.f32.mrf.mxu0 }
 0x213   : > { %v721_v26 = vmul.f32 %v719_v24, %v711_v22  ;;  %v714_v27 = vadd.f32 %v1011_v20, %v713_v25 }
 0x214   : > { %v1082_v28 = vpop.f32.mrf.mxu0 }
 0x215   : > { %v723_v29 = vmul.f32 %v721_v26, %v711_v22  ;;  %v720_v30 = vmul.f32 0.044715, %v714_v27  ;;  %v718_v44 = vmul.f32 0.5, %v714_v27 }
 0x217   : > { %v725_v31 = vadd.f32 %v723_v29, %v711_v22  ;;  %v722_v32 = vmul.f32 %v720_v30, %v714_v27 }
 0x219   : > { %v727_v6 = vmul.f32 0.7978846, %v725_v31  ;;  %v724_v33 = vmul.f32 %v722_v32, %v714_v27 }
 0x21b   : > { %1197 = vtanh.f32 %v727_v6  ;;  %v726_v7 = vadd.f32 %v724_v33, %v714_v27 }
 0x21d   : > { %v728_v34 = vmul.f32 0.7978846, %v726_v7 }
 0x21f   : > { %1199 = vtanh.f32 %v728_v34 }
 0x228   : > { %v1198_v35 = vpop.eup %1197 }
 0x229   : > { %v731_v37 = vadd.f32 1.0, %v1198_v35 }
 0x22b   : > { %v733_v40 = vmul.f32 %v731_v37, %v717_v36 }
 0x22c   : > { %v1200_v41 = vpop.eup %1199 }
 0x22d   : > { %v739_v43 = vmul.f32 %v1020_v39, %v733_v40  ;;  %v732_v45 = vadd.f32 1.0, %v1200_v41 }
 0x22f   : > { %v745_v46 = vadd.f32 %v1021_v42, %v739_v43  ;;  %v734_v47 = vmul.f32 %v732_v45, %v718_v44 }
 0x231   : > { %747 = vst [vmem:[#allocation2 + $0x8] sm:$0xff] %v745_v46  ;;  %v740_v48 = vmul.f32 %v1020_v39, %v734_v47  ;;  %752 = sbr.rel (%p1022_p1) target bundleno = 798 (0x31e), region = 60 }
 0x233   : > { %v746_v49 = vadd.f32 %v1021_v42, %v740_v48 }
 0x235   : > { %748 = vst [vmem:[#allocation2 + $0x10] sm:$0xff] %v746_v49 }
 0x236   : > { %v1201_v50 = vld [vmem:[%s1579_s6 + $0x38] sm:$0xff]   ;;  %v1307_v51 = vmov 0.0   ;;  %v1202_v52 = vld [vmem:[%s1579_s6 + $0x30] sm:$0xff]   ;;  %vm1308_vm3 = vmmov 0   ;;  %v1203_v53 = vld [vmem:[%s1579_s6 + $0x28] sm:$0xff]  }
 0x237   : > { %1083 = vmatprep.subr.bf16.mxu0 %v1307_v51  ;;  %1099 = vmatprep.mubr.msk.bf16.mxu0 %vm1308_vm3, %v1307_v51  ;;  %v1204_v58 = vld [vmem:[%s1579_s6 + $0x20] sm:$0xff]   ;;  %v1205_v61 = vld [vmem:[%s1579_s6 + $0x18] sm:$0xff]   ;;  %v1206_v63 = vld [vmem:[%s1579_s6 + $0x10] sm:$0xff]  }
 0x238   : > { %1084 = vmatpush3.bf16.msra.mxu0 %v1201_v50  ;;  %v753_v55 = vld [vmem:[#allocation2 + $0x8] sm:$0xff]  ;;  %v1208_v3 = vld [vmem:[%s1579_s6] sm:$0xff]  }
 0x239   : > { %1085 = vmatprep.subr.bf16.mxu0 %v1307_v51  ;;  %v1207_v38 = vld [vmem:[%s1579_s6 + $0x8] sm:$0xff]   ;;  %v781_v5 = vld [vmem:[%s1580_s7] sm:$0x1] }
 0x23c   : > { %1086 = vmatpush3.bf16.msra.mxu0 %v1202_v52  ;;  %v754_v56 = vld [vmem:[#allocation2 + $0x10] sm:$0xff] }
 0x23d   : > { %1087 = vmatprep.subr.bf16.mxu0 %v1307_v51  ;;  %v755_v57 = vadd.f32 %v754_v56, %v753_v55 }
 0x23f   : > { %v756_v59 = vrot.slane %v755_v57, 4 }
 0x240   : > { %1088 = vmatpush3.bf16.msra.mxu0 %v1203_v53 }
 0x241   : > { %1089 = vmatprep.subr.bf16.mxu0 %v1307_v51  ;;  %v757_v60 = vadd.f32 %v756_v59, %v755_v57 }
 0x243   : > { %v758_v54 = vrot.slane %v757_v60, 2 }
 0x244   : > { %1090 = vmatpush3.bf16.msra.mxu0 %v1204_v58 }
 0x245   : > { %1091 = vmatprep.subr.bf16.mxu0 %v1307_v51  ;;  %v759_v62 = vadd.f32 %v758_v54, %v757_v60 }
 0x247   : > { %v760_v0 = vrot.slane %v759_v62, 1 }
 0x248   : > { %1092 = vmatpush3.bf16.msra.mxu0 %v1205_v61 }
 0x249   : > { %1093 = vmatprep.subr.bf16.mxu0 %v1307_v51  ;;  %v761_v1 = vadd.f32 %v760_v0, %v759_v62 }
 0x24b   : > { %v763_v2 = vmul.f32 0.0625, %v761_v1 }
 0x24c   : > { %1094 = vmatpush3.bf16.msra.mxu0 %v1206_v63 }
 0x24d   : > { %1095 = vmatprep.subr.bf16.mxu0 %v1307_v51  ;;  %v764_v4 = vpack.c.bf16 %v763_v2, %v763_v2 }
 0x250   : > { %1096 = vmatpush3.bf16.msra.mxu0 %v1207_v38 }
 0x251   : > { %1097 = vmatprep.subr.bf16.mxu0 %v1307_v51 }
 0x254   : > { %1098 = vmatpush3.bf16.msra.mxu0 %v1208_v3 }
 0x257   : > { %1100 = vmatmul.mubr.bf16.vlgmr.msra.gmra.mxu0 %v764_v4 }
 0x317   : > { %v864_v8 = vpop.f32.mrf.mxu0 }
 0x318   : > { %v865_v9 = vadd.f32 %v864_v8, %v781_v5 }
 0x319   : > { %v1101_v10 = vpop.f32.mrf.mxu0 }
 0x31a   : > { %vm870_vm4 = vcmp.ge.f32.partialorder %v865_v9, 0.0  ;;  %v871_v11 = vmul.f32 0.01, %v865_v9 }
 0x31b   : > { %v867_v12 = vpop.f32.mrf.mxu0 }
 0x31c   : > { %v872_v13 = vsel %vm870_vm4, %v865_v9, %v871_v11 }
 0x31d   : > { %873 = vst [vmem:[%s1449_s25] sm:$0x1] %v872_v13  ;;  %v1102_v14 = vpop.f32.mrf.mxu0 }
 0x31e PF: > { %s1031_s24 = sshll.u32 %s1289_s9, 4  ;;  %s887_s20 = sshll.u32 %s1449_s25, 4  ;;  %s888_s20 = int_to_ptr.vmem [resolvable:$true] %s887_s20 }
 0x31f   : > { %s885_s19 = scalar_lea.hbm %s1581_s8, %s1031_s24  ;;  %s1599_s30 = sand.u32 1, %s1277_s28  }
 0x320   : > { %s875_s23 = scalar_lea.sflag [#allocation4], %s1599_s30  ;;  %s1209_s26 = scalar_lea.vmem %s888_s20, 16 }
 0x321   : > { %p1210_p2 = scmp.ne.s32.totalorder %s888_s20, %s1209_s26  ;;  %s1309_s16 = smov [#allocation3]  }
 0x322   : > { %s1213_s13 = sshll.u32 %s1309_s16, 4  ;;  %s1214_s13 = int_to_ptr.vmem [resolvable:$false] %s1213_s13 }
 0x323   : > { %p1211_p4 = pnand %p1210_p2, %p1404_p3  ;;  %s1215_s27 = scalar_lea.vmem %s1214_s13, 32 }
 0x324   : > { %p1216_p6 = scmp.lt.s32.totalorder %s888_s20, %s1214_s13  ;;  %p1217_p7 = scmp.lt.s32.totalorder %s1215_s27, %s1209_s26 }
 0x325   : > { %p1212_p5 = pneg %p1211_p4 }
 0x326   : > { %p1218_p8 = por %p1217_p7, %p1216_p6 }
 0x328   : > { %p1219_p10 = pnand %p1218_p8, %p1212_p5 }
 0x32a   : > { %1222 = shalt.err (!%p1219_p10)
}
 0x32b   : > { %s1223_s9 = scalar_lea.hbm %s885_s19, 16  ;;  %s1227_s10 = scalar_lea.hbm %s1581_s8, 32 }
 0x32c   : > { %p1224_p11 = scmp.ne.s32.totalorder %s885_s19, %s1223_s9  ;;  %p1228_p0 = scmp.lt.s32.totalorder %s885_s19, %s1581_s8 }
 0x32d   : > { %p1229_p1 = scmp.lt.s32.totalorder %s1227_s10, %s1223_s9 }
 0x32e   : > { %p1225_p12 = pnand %p1224_p11, %p1404_p3 }
 0x32f   : > { %p1230_p2 = por %p1229_p1, %p1228_p0 }
 0x330   : > { %p1226_p13 = pneg %p1225_p12 }
 0x332   : > { %p1231_p4 = pnand %p1230_p2, %p1226_p13 }
 0x334   : > { %1234 = shalt.err (!%p1231_p4)
}
 0x335   : > { %1103 = dma.vmem_to_hbm [thread:$0]  (%p1404_p3), %s888_s20, 16, %s885_s19, %s875_s23  }
 0x336 PF: > { %s1600_s21 = sld [smem:[#allocation6_spill]]  ;;  %p1109_p5 = scmp.ge.s32.totalorder %s1301_s12, 2 }
 0x338   : > { %p1106_p6 = pnand %p1109_p5, %p1414_p9 }
 0x33a   : > { %p1107_p7 = pneg %p1106_p6 }
 0x33c   : > { %s899_s24 = sand.u32 1, %s1600_s21  }
 0x33d   : > { %s900_s22 = scalar_lea.sflag [#allocation4], %s899_s24 }
 0x33e   : > { %1268 = dma.done.wait (%p1107_p7), %s900_s22, 16  }
 0x33f   : > { %1270 = vsyncadd (%p1107_p7), %s900_s22, 4294967280  ;;  %s21_s12 = sadd.s32 1, %s1301_s12   ;;  %s1602_s14 = sld [smem:[#allocation7_spill]] }
 0x340   : > { %p18_p8 = scmp.ge.s32.totalorder %s21_s12, 6   ;;  %s1603_s29 = sld [smem:[#allocation13_spill]] }
 0x341   : > { %s1604_s30 = sld [smem:[#allocation8_spill]]  ;;  %s1608_s27 = smov %s1277_s28 }
 0x342   : > { %s1605_s9 = sld [smem:[#allocation9_spill]]  ;;  %20 = sbr.rel (!%p18_p8) target bundleno = 5 (0x5), region = 104 }
 0x343   : > { %s1606_s10 = sld [smem:[#allocation10_spill]] }
 0x344   : > { %s1607_s11 = sld [smem:[#allocation11_spill]] }
 0x345   : > { %s1609_s28 = smov %s1602_s14 }
 0x347   :  { %904 = vsyncpa [#allocation4], 1 }
 0x348   :  { %906 = vsyncpa [#allocation4 + $0x1], 1 }

</bundles_post_ra>
